<compile_context>
chip_gen: v7x
topology: tpu7x:2x2x1
jax: 0.10.0
libtpu: 0.0.40
codegen_flags: <defaults>
</compile_context>

<pallas_src>
import jax
import jax.numpy as jnp
from jax.experimental import pallas as pl
from jax.experimental.pallas import tpu as pltpu

EPS = 1e-5


# ----------------------------------------------------------------------------
# Fused kernel: one grid step == NB images; both octave branches in one step.
# ----------------------------------------------------------------------------
def _octave_conv_bn_kernel(ah_ref, al_ref, wmh_ref, wml_ref,
                           offh_ref, offl_ref, oh_ref, ol_ref):
    # High branch: (Cho, 9*Ct_h) @ (9*Ct_h, NB*Ho*Wo) on the MXU, bf16 operands,
    # f32 accumulation. Output columns are lane-dense (multiple of 128).
    yh = jnp.dot(wmh_ref[...], ah_ref[0], preferred_element_type=jnp.float32)
    oh_ref[0] = yh + offh_ref[...]          # folded conv-bias + BN affine, f32

    # Low branch: (Clo, 9*Ct_l) @ (9*Ct_l, NB*Hq*Wq).
    yl = jnp.dot(wml_ref[...], al_ref[0], preferred_element_type=jnp.float32)
    ol_ref[0] = yl + offl_ref[...]


# ----------------------------------------------------------------------------
# Wrapper helpers: pooling + layout plumbing (pad, patch extraction, weight fold).
# ----------------------------------------------------------------------------
def _avgpool2(x_nchw):
    n, c, h, w = x_nchw.shape
    return x_nchw.reshape(n, c, h // 2, 2, w // 2, 2).mean(axis=(3, 5))


def _nhwc(x_nchw):
    return jnp.transpose(x_nchw, (0, 2, 3, 1))


def _im2col_cols(x_nhwc, nb):
    """(N, H, W, Ct) -> bf16 (G, 9*Ct, nb*H*W) patch operand (3x3 conv, pad=1).

    Column s = nb_idx*H*W + h*W + w holds the receptive field of output pixel
    (h, w) of image g*nb + nb_idx; rows are ordered (kh, kw, c) to match
    `_weights_to_mat`. Pure layout work (pad + 9 shifted slices + transpose).
    """
    n, h, w, ct = x_nhwc.shape
    g = n // nb
    xp = jnp.pad(x_nhwc, ((0, 0), (1, 1), (1, 1), (0, 0)))
    taps = [xp[:, kh:kh + h, kw:kw + w, :]
            for kh in range(3) for kw in range(3)]
    a = jnp.stack(taps, axis=3)                      # (N, H, W, 9, Ct)
    a = a.reshape(g, nb * h * w, 9 * ct)             # (G, nb*H*W, 9*Ct)
    a = jnp.transpose(a, (0, 2, 1))                  # (G, 9*Ct, nb*H*W)
    return a.astype(jnp.bfloat16)


def _weights_to_mat(w_oihw, bn_scale):
    """(Cout, Ct, 3, 3) -> bf16 (Cout, 9*Ct), rows ordered (kh, kw, c), with the
    inference BatchNorm scale folded in (fold done in f32, then one bf16 cast)."""
    cout, ct = w_oihw.shape[0], w_oihw.shape[1]
    m = jnp.transpose(w_oihw, (0, 2, 3, 1)).reshape(cout, 9 * ct)
    return (m * bn_scale[:, None]).astype(jnp.bfloat16)


# ----------------------------------------------------------------------------
# Forward wrapper.
# ----------------------------------------------------------------------------
def conv_bn_forward(x_h, x_l, p, *, block_batch=8):
    """Conv_BN forward (OctaveConv stride=2 tuple path + inference BatchNorm).

    x_h: (N, C_h, H, W) NCHW; x_l: (N, C_l, H//2, W//2) NCHW (PyTorch layout).
    Returns (out_h, out_l) in NCHW.
    """
    N, C_h, H, W = x_h.shape
    _, C_l, Hl, Wl = x_l.shape
    # Shape guards (review correctness concern): stride-2 octave needs /4 spatial.
    assert H % 4 == 0 and W % 4 == 0, "H and W must be divisible by 4"
    assert (Hl, Wl) == (H // 2, W // 2), "x_l must be half-resolution of x_h"
    nb = min(block_batch, N)
    assert N % nb == 0, "batch must be divisible by per-step image count"
    G = N // nb

    Ho, Wo = H // 2, W // 2          # high-frequency output spatial
    Hq, Wq = H // 4, W // 4          # low-frequency output spatial

    # --- pools in the wrapper (NOT folded into weights): tiny XLA ops --------
    xh_d = _avgpool2(x_h)            # (N, C_h, Ho, Wo)  -> conv_h2h input
    xh_dd = _avgpool2(xh_d)          # (N, C_h, Hq, Wq)  -> conv_h2l input
    xl_d = _avgpool2(x_l)            # (N, C_l, Hq, Wq)  -> conv_l2l input

    # --- per-branch channel concat + halo pad + im2col (layout only) --------
    xin_h = jnp.concatenate([_nhwc(x_l), _nhwc(xh_d)], axis=-1)    # (N,Ho,Wo,C_l+C_h)
    xin_l = jnp.concatenate([_nhwc(xh_dd), _nhwc(xl_d)], axis=-1)  # (N,Hq,Wq,C_h+C_l)
    a_h = _im2col_cols(xin_h, nb)    # bf16 (G, 9*Ct_h, nb*Ho*Wo)
    a_l = _im2col_cols(xin_l, nb)    # bf16 (G, 9*Ct_l, nb*Hq*Wq)

    # --- combined conv weights + folded bias / inference BatchNorm ----------
    w_high = jnp.concatenate([p["w_l2h"], p["w_h2h"]], axis=1)     # (Cho, C_l+C_h,3,3)
    b_high = p["b_l2h"] + p["b_h2h"]
    w_low = jnp.concatenate([p["w_h2l"], p["w_l2l"]], axis=1)      # (Clo, C_h+C_l,3,3)
    b_low = p["b_h2l"] + p["b_l2l"]

    scale_h = p["bn_h_gamma"] * jax.lax.rsqrt(p["bn_h_var"] + EPS)
    shift_h = p["bn_h_beta"] - p["bn_h_mean"] * scale_h
    scale_l = p["bn_l_gamma"] * jax.lax.rsqrt(p["bn_l_var"] + EPS)
    shift_l = p["bn_l_beta"] - p["bn_l_mean"] * scale_l

    wmat_h = _weights_to_mat(w_high, scale_h)                      # bf16 (Cho, 9*Ct_h)
    wmat_l = _weights_to_mat(w_low, scale_l)                       # bf16 (Clo, 9*Ct_l)
    off_h = (b_high * scale_h + shift_h).reshape(-1, 1).astype(jnp.float32)
    off_l = (b_low * scale_l + shift_l).reshape(-1, 1).astype(jnp.float32)

    Cho, Ct_h = w_high.shape[0], w_high.shape[1]
    Clo, Ct_l = w_low.shape[0], w_low.shape[1]
    SH = nb * Ho * Wo                # 512 at the test size -> lane dense
    SL = nb * Hq * Wq                # 128 at the test size -> lane dense

    out_h_blk, out_l_blk = pl.pallas_call(
        _octave_conv_bn_kernel,
        out_shape=(jax.ShapeDtypeStruct((G, Cho, SH), jnp.float32),
                   jax.ShapeDtypeStruct((G, Clo, SL), jnp.float32)),
        grid=(G,),
        in_specs=[
            pl.BlockSpec((1, 9 * Ct_h, SH), lambda g: (g, 0, 0)),
            pl.BlockSpec((1, 9 * Ct_l, SL), lambda g: (g, 0, 0)),
            pl.BlockSpec((Cho, 9 * Ct_h), lambda g: (0, 0)),
            pl.BlockSpec((Clo, 9 * Ct_l), lambda g: (0, 0)),
            pl.BlockSpec((Cho, 1), lambda g: (0, 0)),
            pl.BlockSpec((Clo, 1), lambda g: (0, 0)),
        ],
        out_specs=(pl.BlockSpec((1, Cho, SH), lambda g: (g, 0, 0)),
                   pl.BlockSpec((1, Clo, SL), lambda g: (g, 0, 0))),
        compiler_params=pltpu.CompilerParams(
            dimension_semantics=("parallel",)),
    )(a_h, a_l, wmat_h, wmat_l, off_h, off_l)

    # (G, Cout, nb, H, W) -> (N, Cout, H, W): layout plumbing only.
    out_h = out_h_blk.reshape(G, Cho, nb, Ho, Wo).transpose(0, 2, 1, 3, 4)
    out_h = out_h.reshape(N, Cho, Ho, Wo)
    out_l = out_l_blk.reshape(G, Clo, nb, Hq, Wq).transpose(0, 2, 1, 3, 4)
    out_l = out_l.reshape(N, Clo, Hq, Wq)
    return out_h, out_l


# ----------------------------------------------------------------------------
# Pure-JAX reference (mirrors the PyTorch module; NCHW/OIHW, f32 HIGHEST).
# ----------------------------------------------------------------------------
def _ref_conv3x3(x, w, b):
    y = jax.lax.conv_general_dilated(
        x, w, window_strides=(1, 1), padding=((1, 1), (1, 1)),
        dimension_numbers=("NCHW", "OIHW", "NCHW"),
        precision=jax.lax.Precision.HIGHEST)
    return y + b[None, :, None, None]


def ref_forward(x_h, x_l, p):
    xh_d = _avgpool2(x_h)
    xh_dd = _avgpool2(xh_d)
    xl_d = _avgpool2(x_l)
    x_h2h = _ref_conv3x3(xh_d, p["w_h2h"], p["b_h2h"])
    x_h2l = _ref_conv3x3(xh_dd, p["w_h2l"], p["b_h2l"])
    x_l2l = _ref_conv3x3(xl_d, p["w_l2l"], p["b_l2l"])
    x_l2h = _ref_conv3x3(x_l, p["w_l2h"], p["b_l2h"])
    yh = x_l2h + x_h2h
    yl = x_h2l + x_l2l
    sch = p["bn_h_gamma"] / jnp.sqrt(p["bn_h_var"] + EPS)
    shh = p["bn_h_beta"] - p["bn_h_mean"] * sch
    scl = p["bn_l_gamma"] / jnp.sqrt(p["bn_l_var"] + EPS)
    shl = p["bn_l_beta"] - p["bn_l_mean"] * scl
    yh = yh * sch[None, :, None, None] + shh[None, :, None, None]
    yl = yl * scl[None, :, None, None] + shl[None, :, None, None]
    return yh, yl


# ----------------------------------------------------------------------------
if __name__ == "__main__":
    key = jax.random.PRNGKey(0)
    N = 16                                           # 2 grid steps x 8 images/step
    in_channels = out_channels = 8
    alpha_in = alpha_out = 0.5
    C_l_in = int(alpha_in * in_channels)             # 4
    C_h_in = in_channels - C_l_in                    # 4
    C_l_out = int(alpha_out * out_channels)          # 4
    C_h_out = out_channels - C_l_out                 # 4
    H = W = 16                                       # high-frequency spatial
    Hl, Wl = H // 2, W // 2                          # low-frequency spatial

    ks = jax.random.split(key, 8)
    x_h = jax.random.normal(ks[0], (N, C_h_in, H, W), jnp.float32)     # NCHW
    x_l = jax.random.normal(ks[1], (N, C_l_in, Hl, Wl), jnp.float32)   # NCHW

    def conv_params(k, cin, cout):
        k1, k2 = jax.random.split(k)
        bound = 1.0 / (cin * 9) ** 0.5
        w = jax.random.uniform(k1, (cout, cin, 3, 3), jnp.float32, -bound, bound)
        b = jax.random.uniform(k2, (cout,), jnp.float32, -bound, bound)
        return w, b

    def bn_params(k, c):
        k1, k2, k3, k4 = jax.random.split(k, 4)
        gamma = 1.0 + 0.1 * jax.random.normal(k1, (c,), jnp.float32)
        beta = 0.1 * jax.random.normal(k2, (c,), jnp.float32)
        mean = 0.1 * jax.random.normal(k3, (c,), jnp.float32)
        var = jnp.abs(jax.random.normal(k4, (c,), jnp.float32)) + 0.5
        return gamma, beta, mean, var

    w_h2h, b_h2h = conv_params(ks[2], C_h_in, C_h_out)
    w_l2h, b_l2h = conv_params(ks[3], C_l_in, C_h_out)
    w_h2l, b_h2l = conv_params(ks[4], C_h_in, C_l_out)
    w_l2l, b_l2l = conv_params(ks[5], C_l_in, C_l_out)
    gh, bh, mh, vh = bn_params(ks[6], C_h_out)
    gl, bl, ml, vl = bn_params(ks[7], C_l_out)

    params = dict(
        w_h2h=w_h2h, b_h2h=b_h2h, w_l2h=w_l2h, b_l2h=b_l2h,
        w_h2l=w_h2l, b_h2l=b_h2l, w_l2l=w_l2l, b_l2l=b_l2l,
        bn_h_gamma=gh, bn_h_beta=bh, bn_h_mean=mh, bn_h_var=vh,
        bn_l_gamma=gl, bn_l_beta=bl, bn_l_mean=ml, bn_l_var=vl,
    )

    out_h, out_l = jax.jit(conv_bn_forward)(x_h, x_l, params)
    out_h = jax.block_until_ready(out_h)
    out_l = jax.block_until_ready(out_l)

    ref_h, ref_l = ref_forward(x_h, x_l, params)

    assert out_h.shape == (N, C_h_out, Hl, Wl), out_h.shape
    assert out_l.shape == (N, C_l_out, Hl // 2, Wl // 2), out_l.shape
    # Documented precision note: the kernel uses bf16 MXU operands with f32
    # accumulation (same effective arithmetic as a default-precision f32 TPU
    # matmul); the reference uses HIGHEST-precision f32 convolutions, so a small
    # bf16-rounding discrepancy is expected and accepted.
    err_h = float(jnp.max(jnp.abs(out_h - ref_h)))
    err_l = float(jnp.max(jnp.abs(out_l - ref_l)))
    assert jnp.allclose(out_h, ref_h, rtol=2e-2, atol=2e-2), err_h
    assert jnp.allclose(out_l, ref_l, rtol=2e-2, atol=2e-2), err_l

    print("KERNEL_OK")
</pallas_src>

<mosaic_0001>
module attributes {stable_mosaic.version = 11 : i64} {
  func.func @_octave_conv_bn_kernel(%arg0: i32, %arg1: memref<1x72x512xbf16, #tpu.memory_space<vmem>>, %arg2: memref<1x72x128xbf16, #tpu.memory_space<vmem>>, %arg3: memref<4x72xbf16, #tpu.memory_space<vmem>>, %arg4: memref<4x72xbf16, #tpu.memory_space<vmem>>, %arg5: memref<4x1xf32, #tpu.memory_space<vmem>>, %arg6: memref<4x1xf32, #tpu.memory_space<vmem>>, %arg7: memref<1x4x512xf32, #tpu.memory_space<vmem>>, %arg8: memref<1x4x128xf32, #tpu.memory_space<vmem>>) attributes {dimension_semantics = [#tpu.dimension_semantics<parallel>], iteration_bounds = array<i64: 2>, scalar_prefetch = 0 : i64, scratch_operands = 0 : i64, tpu.core_type = #tpu.core_type<tc>, window_params = [{transform_indices = @transform_0, window_bounds = array<i64: 1, 72, 512>}, {transform_indices = @transform_1, window_bounds = array<i64: 1, 72, 128>}, {pipeline_mode = #tpu.pipeline_mode<synchronous>, transform_indices = @transform_2, window_bounds = array<i64: 4, 72>}, {pipeline_mode = #tpu.pipeline_mode<synchronous>, transform_indices = @transform_3, window_bounds = array<i64: 4, 72>}, {pipeline_mode = #tpu.pipeline_mode<synchronous>, transform_indices = @transform_4, window_bounds = array<i64: 4, 1>}, {pipeline_mode = #tpu.pipeline_mode<synchronous>, transform_indices = @transform_5, window_bounds = array<i64: 4, 1>}, {transform_indices = @transform_6, window_bounds = array<i64: 1, 4, 512>}, {transform_indices = @transform_7, window_bounds = array<i64: 1, 4, 128>}]} {
    %c0 = arith.constant 0 : index
    %c0_0 = arith.constant 0 : index
    %0 = vector.load %arg3[%c0, %c0_0] : memref<4x72xbf16, #tpu.memory_space<vmem>>, vector<4x72xbf16>
    %c0_1 = arith.constant 0 : index
    %c0_2 = arith.constant 0 : index
    %c0_3 = arith.constant 0 : index
    %1 = vector.load %arg1[%c0_1, %c0_2, %c0_3] : memref<1x72x512xbf16, #tpu.memory_space<vmem>>, vector<1x72x512xbf16>
    %2 = vector.shape_cast %1 : vector<1x72x512xbf16> to vector<72x512xbf16>
    %cst = arith.constant dense<0.000000e+00> : vector<4x512xf32>
    %3 = tpu.matmul %0, %2, %cst {dimension_numbers = #tpu.dot_dimension_numbers<[1], [0], [0], [1], [0, 0, 1, 1], [], []>} : vector<4x72xbf16>, vector<72x512xbf16>, vector<4x512xf32> -> vector<4x512xf32>
    %c0_4 = arith.constant 0 : index
    %c0_5 = arith.constant 0 : index
    %4 = vector.load %arg5[%c0_4, %c0_5] : memref<4x1xf32, #tpu.memory_space<vmem>>, vector<4x1xf32>
    %5 = vector.broadcast %4 : vector<4x1xf32> to vector<4x512xf32>
    %6 = arith.addf %3, %5 : vector<4x512xf32>
    %c0_6 = arith.constant 0 : index
    %c0_7 = arith.constant 0 : index
    %c0_8 = arith.constant 0 : index
    %7 = vector.load %arg7[%c0_6, %c0_7, %c0_8] : memref<1x4x512xf32, #tpu.memory_space<vmem>>, vector<1x4x512xf32>
    %8 = vector.shape_cast %7 : vector<1x4x512xf32> to vector<4x512xf32>
    %9 = vector.shape_cast %6 : vector<4x512xf32> to vector<1x4x512xf32>
    tpu.vector_store %arg7[%c0_6, %c0_7, %c0_8], %9 {strides = array<i32>} : memref<1x4x512xf32, #tpu.memory_space<vmem>>, vector<1x4x512xf32>,
    %c0_9 = arith.constant 0 : index
    %c0_10 = arith.constant 0 : index
    %10 = vector.load %arg4[%c0_9, %c0_10] : memref<4x72xbf16, #tpu.memory_space<vmem>>, vector<4x72xbf16>
    %c0_11 = arith.constant 0 : index
    %c0_12 = arith.constant 0 : index
    %c0_13 = arith.constant 0 : index
    %11 = vector.load %arg2[%c0_11, %c0_12, %c0_13] : memref<1x72x128xbf16, #tpu.memory_space<vmem>>, vector<1x72x128xbf16>
    %12 = vector.shape_cast %11 : vector<1x72x128xbf16> to vector<72x128xbf16>
    %cst_14 = arith.constant dense<0.000000e+00> : vector<4x128xf32>
    %13 = tpu.matmul %10, %12, %cst_14 {dimension_numbers = #tpu.dot_dimension_numbers<[1], [0], [0], [1], [0, 0, 1, 1], [], []>} : vector<4x72xbf16>, vector<72x128xbf16>, vector<4x128xf32> -> vector<4x128xf32>
    %c0_15 = arith.constant 0 : index
    %c0_16 = arith.constant 0 : index
    %14 = vector.load %arg6[%c0_15, %c0_16] : memref<4x1xf32, #tpu.memory_space<vmem>>, vector<4x1xf32>
    %15 = vector.broadcast %14 : vector<4x1xf32> to vector<4x128xf32>
    %16 = arith.addf %13, %15 : vector<4x128xf32>
    %c0_17 = arith.constant 0 : index
    %c0_18 = arith.constant 0 : index
    %c0_19 = arith.constant 0 : index
    %17 = vector.load %arg8[%c0_17, %c0_18, %c0_19] : memref<1x4x128xf32, #tpu.memory_space<vmem>>, vector<1x4x128xf32>
    %18 = vector.shape_cast %17 : vector<1x4x128xf32> to vector<4x128xf32>
    %19 = vector.shape_cast %16 : vector<4x128xf32> to vector<1x4x128xf32>
    tpu.vector_store %arg8[%c0_17, %c0_18, %c0_19], %19 {strides = array<i32>} : memref<1x4x128xf32, #tpu.memory_space<vmem>>, vector<1x4x128xf32>,
    return
  }
  func.func @transform_0(%arg0: i32) -> (i32, i32, i32) {
    %c0_i32 = arith.constant 0 : i32
    %c0_i32_0 = arith.constant 0 : i32
    %c0_i32_1 = arith.constant 0 : i32
    return %arg0, %c0_i32, %c0_i32_0 : i32, i32, i32
  }
  func.func @transform_1(%arg0: i32) -> (i32, i32, i32) {
    %c0_i32 = arith.constant 0 : i32
    %c0_i32_0 = arith.constant 0 : i32
    %c0_i32_1 = arith.constant 0 : i32
    return %arg0, %c0_i32, %c0_i32_0 : i32, i32, i32
  }
  func.func @transform_2(%arg0: i32) -> (i32, i32) {
    %c0_i32 = arith.constant 0 : i32
    %c0_i32_0 = arith.constant 0 : i32
    %c0_i32_1 = arith.constant 0 : i32
    return %c0_i32, %c0_i32_0 : i32, i32
  }
  func.func @transform_3(%arg0: i32) -> (i32, i32) {
    %c0_i32 = arith.constant 0 : i32
    %c0_i32_0 = arith.constant 0 : i32
    %c0_i32_1 = arith.constant 0 : i32
    return %c0_i32, %c0_i32_0 : i32, i32
  }
  func.func @transform_4(%arg0: i32) -> (i32, i32) {
    %c0_i32 = arith.constant 0 : i32
    %c0_i32_0 = arith.constant 0 : i32
    %c0_i32_1 = arith.constant 0 : i32
    return %c0_i32, %c0_i32_0 : i32, i32
  }
  func.func @transform_5(%arg0: i32) -> (i32, i32) {
    %c0_i32 = arith.constant 0 : i32
    %c0_i32_0 = arith.constant 0 : i32
    %c0_i32_1 = arith.constant 0 : i32
    return %c0_i32, %c0_i32_0 : i32, i32
  }
  func.func @transform_6(%arg0: i32) -> (i32, i32, i32) {
    %c0_i32 = arith.constant 0 : i32
    %c0_i32_0 = arith.constant 0 : i32
    %c0_i32_1 = arith.constant 0 : i32
    return %arg0, %c0_i32, %c0_i32_0 : i32, i32, i32
  }
  func.func @transform_7(%arg0: i32) -> (i32, i32, i32) {
    %c0_i32 = arith.constant 0 : i32
    %c0_i32_0 = arith.constant 0 : i32
    %c0_i32_1 = arith.constant 0 : i32
    return %arg0, %c0_i32, %c0_i32_0 : i32, i32, i32
  }
}

</mosaic_0001>

<bundles_post_ra>
// kernel: conv_bn_forward.1
= control target key start
LH: loop header
LB: loop body
LE: loop exit
PB: predicated region body
PF: predicated region fallthrough
CT: control target
= control target key end

     0   :  { %s884_s24 = smov 0   ;;  %s960_s0 = inlined_call_operand.vmem [shape: bf16[2,72,512], index: 0, kind: input, shape index: {}]   ;;  %s961_s1 = inlined_call_operand.vmem [shape: bf16[2,72,128], index: 1, kind: input, shape index: {}]   ;;  %s962_s2 = inlined_call_operand.vmem [shape: bf16[4,72], index: 2, kind: input, shape index: {}]   ;;  %s963_s3 = inlined_call_operand.vmem [shape: bf16[4,72], index: 3, kind: input, shape index: {}]   ;;  %s964_s4 = inlined_call_operand.vmem [shape: f32[4,1], index: 4, kind: input, shape index: {}]   ;;  %s965_s5 = inlined_call_operand.vmem [shape: f32[4,1], index: 5, kind: input, shape index: {}]   ;;  %s966_s6 = inlined_call_operand.vmem [shape: f32[2,4,512], index: 6, kind: output, shape index: {0}]   ;;  %s967_s7 = inlined_call_operand.vmem [shape: f32[2,4,128], index: 7, kind: output, shape index: {1}]  }
   0x1 LB: > { %s723_s25 = sadd.s32 4294967295, %s839_s24   ;;  %p727_p0 = scmp.ge.s32.totalorder %s839_s24, 1  ;;  %s839_s24 = sphi %s884_s24, %s18_s24  }
   0x2   : > { %p250_p1 = scmp.lt.s32.totalorder %s839_s24, 3 }
   0x4   : > { %p251_p2 = pnand %p727_p0, %p250_p1 }
   0x5   : > { %p291_p3 = scmp.lt.s32.totalorder (!%p251_p2), %s723_s25, 1  ;;  %v841_v0 = vmov (!%p251_p2), 0   ;;  %v330_v1 = vld [vmem:[%s964_s4] sm:$0xf] (!%p251_p2)  ;;  %vm430_vm0 = vcmask (!%p251_p2), 1043456   ;;  %vm426_vm1 = vcmask (!%p251_p2), 588800  }
   0x6   : > { %254 = sbr.rel (%p251_p2) target bundleno = 273 (0x111), region = 44  ;;  %475 = vmatprep.mubr.bf16.mxu0 (!%p251_p2), %v841_v0  ;;  %516 = vmatprep.mubr.bf16.mxu1 (!%p251_p2), %v841_v0  ;;  %v545_v2 = vld [vmem:[%s965_s5] sm:$0xf] (!%p251_p2)  ;;  %v842_v28 = vmov (!%p251_p2), 0.0   ;;  %vm843_vm2 = vmmov (!%p251_p2), 0  }
   0x7   : > { %799 = vset.pattern.permute.xlu0 (!%p251_p2), %v841_v0  ;;  %v311_v26 = vld [vmem:[%s962_s2] sm:$0x3] (!%p251_p2) }
   0x8   : > { %333 = vperm.xlu0 (!%p251_p2), %799, %v330_v1   ;;  %v535_v35 = vld [vmem:[%s963_s3] sm:$0x3] (!%p251_p2) }
   0xc   : > { %548 = vperm.xlu0 (!%p251_p2), %799, %v545_v2  }
   0xd   : > { %s969_s25 = smov (!%p291_p3, %s723_s25), 1 }
   0xe   : > { %s786_s28 = smul.u32 144, %s969_s25  ;;  %s765_s19 = sshll.u32 %s969_s25, 4 }
   0xf   : > { %s787_s11 = smul.u32 36, %s969_s25  ;;  %s305_s22 = scalar_lea.vmem %s966_s6, %s765_s19 }
  0x10   : > { %s904_s10 = scalar_lea.vmem %s960_s0, %s786_s28  ;;  %s732_s23 = sshll.u32 %s969_s25, 2 }
  0x11   : > { %v800_v3 = vld [vmem:[%s904_s10 + $0x4] ss:$16 sps:$4 sm:$0xff]   ;;  %v802_v4 = vld [vmem:[%s904_s10] ss:$16 sps:$4 sm:$0xff]   ;;  %v812_v10 = vld [vmem:[%s904_s10 + $0xc] ss:$16 sps:$4 sm:$0xff]   ;;  %s920_s14 = scalar_lea.vmem %s961_s1, %s787_s11  ;;  %s309_s28 = scalar_lea.vmem %s967_s7, %s732_s23 }
  0x12   : > { %443 = vmatprep.subr.bf16.mxu0 %v800_v3  ;;  %v803_v5 = vld [vmem:[%s904_s10 + $0x24] ss:$16 sps:$4 sm:$0xff]   ;;  %v805_v6 = vld [vmem:[%s904_s10 + $0x20] ss:$16 sps:$4 sm:$0xff]   ;;  %v814_v11 = vld [vmem:[%s904_s10 + $0x8] ss:$16 sps:$4 sm:$0xff]   ;;  %484 = vmatprep.subr.bf16.mxu1 %v812_v10 }
  0x13   : > { %444 = vmatpush1.bf16.msra.mxu0 %v802_v4  ;;  %v806_v7 = vld [vmem:[%s904_s10 + $0x44] ss:$16 sps:$4 sm:$0xff]   ;;  %v808_v8 = vld [vmem:[%s904_s10 + $0x40] ss:$16 sps:$4 sm:$0xff]   ;;  %v817_v12 = vld [vmem:[%s904_s10 + $0x2c] ss:$16 sps:$4 sm:$0xff]   ;;  %485 = vmatpush1.bf16.msra.mxu1 %v814_v11 }
  0x14   : > { %445 = vmatprep.subr.bf16.mxu0 %v803_v5  ;;  %v809_v9 = vld [vmem:[%s904_s10 + $0x64] ss:$16 sps:$4 sm:$0xff]   ;;  %v819_v14 = vld [vmem:[%s904_s10 + $0x28] ss:$16 sps:$4 sm:$0xff]   ;;  %486 = vmatprep.subr.bf16.mxu1 %v817_v12  ;;  %v821_v15 = vld [vmem:[%s904_s10 + $0x4c] ss:$16 sps:$4 sm:$0xff]  }
  0x15   : > { %v328_v13 = vld [vmem:[%s904_s10 + $0x80] sm:$0xff]  ;;  %v823_v19 = vld [vmem:[%s904_s10 + $0x48] ss:$16 sps:$4 sm:$0xff]   ;;  %v825_v20 = vld [vmem:[%s904_s10 + $0x6c] ss:$16 sps:$4 sm:$0xff]  }
  0x16   : > { %v811_v16 = vld [vmem:[%s904_s10 + $0x60] ss:$16 sps:$4 sm:$0xff]   ;;  %v750_v17 = vcombine.high %v328_v13, %v328_v13  ;;  %v749_v18 = vcombine.low %v328_v13, %v328_v13  ;;  %v329_v21 = vld [vmem:[%s904_s10 + $0x88] sm:$0xff]  ;;  %v831_v32 = vld [vmem:[%s920_s14 + $0x18] sm:$0xff]  }
  0x17   : > { %446 = vmatpush1.bf16.msra.mxu0 %v805_v6  ;;  %487 = vmatpush1.bf16.msra.mxu1 %v819_v14  ;;  %v827_v23 = vld [vmem:[%s904_s10 + $0x68] ss:$16 sps:$4 sm:$0xff]   ;;  %v752_v24 = vcombine.high %v329_v21, %v329_v21  ;;  %v751_v25 = vcombine.low %v329_v21, %v329_v21  ;;  %v820_v27 = vld [vmem:[%s920_s14] sm:$0xff]   ;;  %v828_v31 = vld [vmem:[%s920_s14 + $0x10] sm:$0xff]  }
  0x18   : > { %447 = vmatprep.subr.bf16.mxu0 %v806_v7  ;;  %488 = vmatprep.subr.bf16.mxu1 %v821_v15  ;;  %v432_v22 = vsel %vm430_vm0, %v749_v18, 0  ;;  %v824_v30 = vld [vmem:[%s920_s14 + $0x8] sm:$0xff]   ;;  %v832_v33 = vld [vmem:[%s920_s14 + $0x20] ss:$0 sps:$4 sm:$0xff]  }
  0x19   : > { %v438_v29 = vsel %vm430_vm0, %v751_v25, 0  ;;  %v582_v34 = vsel %vm430_vm0, %v832_v33, 0 }
  0x1b   : > { %448 = vmatpush1.bf16.msra.mxu0 %v808_v8  ;;  %489 = vmatpush1.bf16.msra.mxu1 %v823_v19 }
  0x1c   : > { %449 = vmatprep.subr.bf16.mxu0 %v809_v9  ;;  %490 = vmatprep.subr.bf16.mxu1 %v825_v20 }
  0x1f   : > { %450 = vmatpush1.bf16.msra.mxu0 %v811_v16  ;;  %491 = vmatpush1.bf16.msra.mxu1 %v827_v23 }
  0x20   : > { %753 = vmatprep.subr.msk.bf16.mxu0 %vm430_vm0, %v750_v17  ;;  %755 = vmatprep.subr.msk.bf16.mxu1 %vm430_vm0, %v752_v24 }
  0x23   : > { %452 = vmatpush1.bf16.msra.mxu0 %v432_v22  ;;  %493 = vmatpush1.bf16.msra.mxu1 %v438_v29 }
  0x24   : > { %772 = vmatprep.subr.bf16.mxu0 %v842_v28 }
  0x26   : > { %754 = vmatmul.mubr.msk.bf16.vlgmr.msra.gmra.mrb[0].mxu0 %vm426_vm1, %v311_v26  ;;  %756 = vmatmul.mubr.msk.bf16.vlgmr.msra.gmra.mrb[0].mxu1 %vm426_vm1, %v311_v26 }
  0x27   : > { %773 = vmatpush3.bf16.msra.mxu0 %v820_v27  ;;  %782 = vmatprep.mubr.msk.bf16.mxu0 %vm843_vm2, %v842_v28 }
  0x28   : > { %774 = vmatprep.subr.bf16.mxu0 %v842_v28 }
  0x2b   : > { %775 = vmatpush3.bf16.msra.mxu0 %v824_v30 }
  0x2c   : > { %776 = vmatprep.subr.bf16.mxu0 %v842_v28 }
  0x2f   : > { %777 = vmatpush3.bf16.msra.mxu0 %v828_v31 }
  0x30   : > { %778 = vmatprep.subr.bf16.mxu0 %v842_v28 }
  0x33   : > { %779 = vmatpush3.bf16.msra.mxu0 %v831_v32 }
  0x34   : > { %780 = vmatprep.subr.bf16.mxu0 %v842_v28 }
  0x37   : > { %781 = vmatpush3.bf16.msra.mxu0 %v582_v34 }
  0x3a   : > { %783 = vmatmul.mubr.msk.bf16.vlgmr.msra.gmra.mrb[4].mxu0 %vm426_vm1, %v535_v35 }
  0x87   : > { %v334_v36 = vpop.permute.xlu0 %333 }
  0x8b   : > { %v549_v51 = vpop.permute.xlu0 %548 }
  0xf9   : > { %v477_v37 = vpop.f32.mrb[0].mxu0  ;;  %v518_v44 = vpop.f32.mrb[0].mxu1 }
  0xfa   : > { %v478_v38 = vadd.f32 %v477_v37, %v334_v36  ;;  %v479_v39 = vpop.f32.mrb[1].mxu0  ;;  %v519_v45 = vadd.f32 %v518_v44, %v334_v36  ;;  %v520_v46 = vpop.f32.mrb[1].mxu1 }
  0xfb   : > { %v480_v40 = vadd.f32 %v479_v39, %v334_v36  ;;  %v481_v41 = vpop.f32.mrb[2].mxu0  ;;  %v521_v47 = vadd.f32 %v520_v46, %v334_v36  ;;  %v522_v48 = vpop.f32.mrb[2].mxu1 }
  0xfc   : > { %v482_v42 = vpop.f32.mrb[3].mxu0  ;;  %v523_v49 = vpop.f32.mrb[3].mxu1 }
  0xfd   : > { %v529_v43 = vcombine.low %v478_v38, %v480_v40  ;;  %v530_v50 = vcombine.low %v519_v45, %v521_v47 }
  0xff   : > { %533 = vst [vmem:[%s305_s22] sm:$0xff] %v529_v43  ;;  %534 = vst [vmem:[%s305_s22 + $0x8] sm:$0xff] %v530_v50 }
 0x10d   : > { %v618_v52 = vpop.f32.mrb[4].mxu0 }
 0x10e   : > { %v619_v53 = vadd.f32 %v618_v52, %v549_v51  ;;  %v784_v54 = vpop.f32.mrb[5].mxu0 }
 0x10f   : > { %v621_v55 = vpop.f32.mrb[6].mxu0 }
 0x110   : > { %624 = vst [vmem:[%s309_s28] sm:$0xf] %v619_v53  ;;  %v785_v56 = vpop.f32.mrb[7].mxu0 }
 0x111 PF: > { %s18_s24 = sadd.s32 1, %s839_s24  }
 0x112   : > { %p15_p4 = scmp.ge.s32.totalorder %s18_s24, 4  }
 0x114   :  { %17 = sbr.rel (!%p15_p4) target bundleno = 1 (0x1), region = 89 }

</bundles_post_ra>
